<compile_context>
chip_gen: v7x
topology: tpu7x:2x2x1
jax: 0.10.0
libtpu: 0.0.40
codegen_flags: <defaults>
</compile_context>

<pallas_src>
import jax
import jax.numpy as jnp
from jax.experimental import pallas as pl
from jax.experimental.pallas import tpu as pltpu


def _round_up(x, m):
    return ((x + m - 1) // m) * m


def _pick_rows_per_tile(m):
    """Large tiles (target 512 rows), multiple of 8, grid >= 2 steps."""
    rpt = min(512, max(8, _round_up(pl.cdiv(m, 2), 8)))
    return rpt


def _bigram_gather_kernel(idx_ref, table_ref, o_ref):
    # idx_ref:   VMEM (rows_per_tile, 1) int32   token ids for this tile
    # table_ref: VMEM (Vp, Ep)                   full padded table (resident)
    # o_ref:     VMEM (rows_per_tile, Ep)
    ids = idx_ref[...]                                         # (rows, 1)
    rows = ids.shape[0]
    vp = table_ref.shape[0]
    lane = jax.lax.broadcasted_iota(jnp.int32, (rows, vp), 1)  # (rows, Vp)
    onehot = (lane == ids).astype(table_ref.dtype)             # (rows, Vp)
    o_ref[...] = jnp.dot(
        onehot, table_ref[...], preferred_element_type=jnp.float32
    ).astype(o_ref.dtype)


def bigram_forward_padded(indices, table_p, vocab_size, embed_dim,
                          *, rows_per_tile=None):
    """indices: (B, T) int.  table_p: (Vp, Ep) pre-padded table.
    Returns (B, T, embed_dim) = original_table[indices]."""
    B, T = indices.shape
    Vp, Ep = table_p.shape
    M = B * T

    if rows_per_tile is None:
        rows_per_tile = _pick_rows_per_tile(M)

    # Pad token count so the grid divides evenly (padded slots gather row 0).
    Mp = _round_up(M, rows_per_tile)
    idx = indices.reshape(M, 1).astype(jnp.int32)
    if Mp != M:
        idx = jnp.pad(idx, ((0, Mp - M), (0, 0)))

    grid = (Mp // rows_per_tile,)

    # VMEM budget: resident table (single-buffered) + 2x output tiles
    # + 2x index tiles + headroom.
    itemsize = jnp.dtype(table_p.dtype).itemsize
    vmem_bytes = (Vp * Ep * itemsize
                  + 2 * rows_per_tile * Ep * itemsize
                  + 2 * rows_per_tile * 4
                  + (4 << 20))
    vmem_limit = int(min(max(vmem_bytes, 16 << 20), 100 << 20))

    out = pl.pallas_call(
        _bigram_gather_kernel,
        out_shape=jax.ShapeDtypeStruct((Mp, Ep), table_p.dtype),
        grid=grid,
        in_specs=[
            # Per-tile token ids (lane-minor dim 1 == full array dim).
            pl.BlockSpec((rows_per_tile, 1), lambda i: (i, 0)),
            # Full table resident in VMEM, constant block index -> one DMA;
            # single-buffered since the block never changes.
            pl.BlockSpec((Vp, Ep), lambda i: (0, 0),
                         pipeline_mode=pl.Buffered(1)),
        ],
        out_specs=pl.BlockSpec((rows_per_tile, Ep), lambda i: (i, 0)),
        compiler_params=pltpu.CompilerParams(
            dimension_semantics=("parallel",),
            vmem_limit_bytes=vmem_limit,
        ),
    )(idx, table_p)

    return out[:M, :embed_dim].reshape(B, T, embed_dim)


class BigramLanguageModel:
    """Pallas port of the PyTorch BigramLanguageModel forward pass.

    The table padding (vocab -> Vp multiple of 128 for the MXU contraction,
    embed -> Ep multiple of 128 for lane-dense stores) is hoisted to
    construction time so it is not a per-call HBM copy.
    """

    def __init__(self, token_embedding_table):
        V, E = token_embedding_table.shape
        self.vocab_size = V
        self.embed_dim = E
        Vp = _round_up(V, 128)
        Ep = _round_up(E, 128)
        self.table_p = jnp.pad(token_embedding_table,
                               ((0, Vp - V), (0, Ep - E)))
        # NOTE: if V*Ep grows beyond the resident-table VMEM budget
        # (~24-28 MiB on v7x), switch to an HBM row-gather path
        # (pl.Element(1) row BlockSpec or Buffered(4-8) DMA batches).

    def __call__(self, indices):
        return bigram_forward_padded(indices, self.table_p,
                                     self.vocab_size, self.embed_dim)


if __name__ == "__main__":
    key = jax.random.PRNGKey(0)
    kt, ki = jax.random.split(key, 2)

    vocab_size = 65          # char-level vocab; deliberately not lane-aligned
    batch, seq = 2, 8

    # nn.Embedding(vocab_size, vocab_size) weight
    table = jax.random.normal(kt, (vocab_size, vocab_size), dtype=jnp.float32)
    indices = jax.random.randint(ki, (batch, seq), 0, vocab_size,
                                 dtype=jnp.int32)

    model = BigramLanguageModel(table)
    out = model(indices)
    out = jax.block_until_ready(out)

    # Reference: plain JAX embedding lookup (same semantics as nn.Embedding).
    ref = jnp.take(table, indices, axis=0)
    assert out.shape == (batch, seq, vocab_size)
    assert jnp.array_equal(out, ref)

    print("KERNEL_OK")
</pallas_src>

<mosaic_0001>
module attributes {stable_mosaic.version = 11 : i64} {
  func.func @_bigram_gather_kernel(%arg0: i32, %arg1: memref<8x1xi32, #tpu.memory_space<vmem>>, %arg2: memref<128x128xf32, #tpu.memory_space<vmem>>, %arg3: memref<8x128xf32, #tpu.memory_space<vmem>>) attributes {dimension_semantics = [#tpu.dimension_semantics<parallel>], iteration_bounds = array<i64: 2>, scalar_prefetch = 0 : i64, scratch_operands = 0 : i64, tpu.core_type = #tpu.core_type<tc>, window_params = [{transform_indices = @transform_0, window_bounds = array<i64: 8, 1>}, {pipeline_mode = #tpu.pipeline_mode<synchronous>, transform_indices = @transform_1, window_bounds = array<i64: 128, 128>}, {transform_indices = @transform_2, window_bounds = array<i64: 8, 128>}]} {
    %c0 = arith.constant 0 : index
    %c0_0 = arith.constant 0 : index
    %0 = vector.load %arg1[%c0, %c0_0] : memref<8x1xi32, #tpu.memory_space<vmem>>, vector<8x1xi32>
    %1 = tpu.iota {dimensions = array<i32: 1>} : vector<8x128xi32>
    %2 = vector.broadcast %0 : vector<8x1xi32> to vector<8x128xi32>
    %3 = arith.cmpi eq, %1, %2 : vector<8x128xi32>
    %4 = arith.extui %3 : vector<8x128xi1> to vector<8x128xi32>
    %5 = arith.sitofp %4 : vector<8x128xi32> to vector<8x128xf32>
    %c0_1 = arith.constant 0 : index
    %c0_2 = arith.constant 0 : index
    %6 = vector.load %arg2[%c0_1, %c0_2] : memref<128x128xf32, #tpu.memory_space<vmem>>, vector<128x128xf32>
    %cst = arith.constant dense<0.000000e+00> : vector<8x128xf32>
    %7 = tpu.matmul %5, %6, %cst {dimension_numbers = #tpu.dot_dimension_numbers<[1], [0], [0], [1], [0, 0, 1, 1], [], []>} : vector<8x128xf32>, vector<128x128xf32>, vector<8x128xf32> -> vector<8x128xf32>
    %c0_3 = arith.constant 0 : index
    %c0_4 = arith.constant 0 : index
    %8 = vector.load %arg3[%c0_3, %c0_4] : memref<8x128xf32, #tpu.memory_space<vmem>>, vector<8x128xf32>
    tpu.vector_store %arg3[%c0_3, %c0_4], %7 {strides = array<i32>} : memref<8x128xf32, #tpu.memory_space<vmem>>, vector<8x128xf32>,
    return
  }
  func.func @transform_0(%arg0: i32) -> (i32, i32) {
    %c0_i32 = arith.constant 0 : i32
    %c0_i32_0 = arith.constant 0 : i32
    return %arg0, %c0_i32 : i32, i32
  }
  func.func @transform_1(%arg0: i32) -> (i32, i32) {
    %c0_i32 = arith.constant 0 : i32
    %c0_i32_0 = arith.constant 0 : i32
    %c0_i32_1 = arith.constant 0 : i32
    return %c0_i32, %c0_i32_0 : i32, i32
  }
  func.func @transform_2(%arg0: i32) -> (i32, i32) {
    %c0_i32 = arith.constant 0 : i32
    %c0_i32_0 = arith.constant 0 : i32
    return %arg0, %c0_i32 : i32, i32
  }
}

</mosaic_0001>

<bundles_post_ra>
// kernel: tpu_custom_call.1
= control target key start
LH: loop header
LB: loop body
LE: loop exit
PB: predicated region body
PF: predicated region fallthrough
CT: control target
= control target key end

     0   :  { %7 = vsyncpa [#allocation3], 0  ;;  %s738_s0 = inlined_call_operand.vmem [shape: s32[16,1], index: 0, kind: input, shape index: {}]   ;;  %s739_s1 = inlined_call_operand.hbm [shape: f32[128,128], index: 1, kind: input, shape index: {}]   ;;  %s740_s2 = inlined_call_operand.hbm [shape: f32[16,128], index: 2, kind: output, shape index: {}]  }
   0x1   :  { %8 = vsyncpa [#allocation4], 0 }
   0x2   :  { %10 = vsyncpa [#allocation4 + $0x1], 0  ;;  %s603_s9 = smov 0   ;;  %s605_s10 = smov 0  }
   0x3   :  { %s607_s11 = smov 0   ;;  %s609_s12 = smov 0  }
   0x4 LB: > { %s624_s13 = sadd.s32 4294967295, %s577_s12   ;;  %s335_s14 = sadd.s32 4294967294, %s577_s12   ;;  %s577_s12 = sphi %s609_s12, %s756_s12   ;;  %s573_s11 = sphi %s607_s11, %s755_s11   ;;  %s569_s10 = sphi %s605_s10, %s754_s10   ;;  %s565_s9 = sphi %s603_s9, %s753_s9  }
   0x5   : > { %s628_s15 = sadd.s32 1, %s577_s12   ;;  %s70_s16 = sadd.s32 1, %s573_s11 }
   0x6   : > { %s67_s17 = ssub.s32 %s577_s12, %s628_s15  ;;  %p80_p0 = scmp.ne.s32.totalorder %s573_s11, %s569_s10 }
   0x7   : > { %p68_p1 = scmp.eq.s32.totalorder %s67_s17, 0  ;;  %p81_p2 = scmp.eq.s32.totalorder %s624_s13, 1 }
   0x8   : > { %p86_p3 = scmp.ne.s32.totalorder %s569_s10, %s565_s9  ;;  %p87_p4 = scmp.eq.s32.totalorder %s335_s14, 1 }
   0x9   : > { %s639_s18 = scalar_select %p68_p1, %s573_s11, %s70_s16  }
   0xa   : > { %p641_p5 = por %p81_p2, %p80_p0  ;;  %p645_p6 = por %p87_p4, %p86_p3 }
   0xb   : > { %p336_p7 = scmp.ge.s32.totalorder %s577_s12, 1  ;;  %p94_p8 = scmp.lt.s32.totalorder %s577_s12, 3 }
   0xc   : > { %s744_s19 = scalar_select %p641_p5, 1, 0 }
   0xd   : > { %s745_s20 = scalar_select %p645_p6, 1, 0 }
   0xe   : > { %p741_p9 = scmp.eq.s32.totalorder %s624_s13, 0  ;;  %p652_p10 = pnand %p336_p7, %p94_p8 }
   0xf   : > { %s579_s22 = smov [#allocation2]   ;;  %s483_s27 = scalar_lea.hbm %s739_s1, 2048 }
  0x10   : > { %s746_s21 = scalar_select %p652_p10, 1, 0 }
  0x11   : > { %s106_s23 = sshll.u32 %s579_s22, 4  ;;  %p431_p11 = pneg %p652_p10  ;;  %s107_s23 = int_to_ptr.vmem [resolvable:$true] %s106_s23 }
  0x12   : > { %p484_p13 = scmp.ne.s32.totalorder %s739_s1, %s483_s27  ;;  %p490_p3 = scmp.lt.u32.totalorder %s483_s27, %s739_s1 }
  0x13   : > { %p660_p12 = pnand %p741_p9, %p431_p11 }
  0x15   : > { %p485_p0 = pneg %p660_p12 }
  0x17   : > { %p486_p1 = pnand %p485_p0, %p484_p13 }
  0x19   : > { %p487_p2 = pneg %p486_p1 }
  0x1b   : > { %p492_p4 = pnand %p490_p3, %p487_p2 }
  0x1d   : > { %495 = shalt.err (!%p492_p4)
}
  0x1e   : > { %s496_s4 = scalar_lea.vmem %s107_s23, 2048  ;;  %p504_p9 = scmp.lt.s32.totalorder %s107_s23, %s107_s23 }
  0x1f   : > { %p497_p7 = scmp.ne.s32.totalorder %s107_s23, %s496_s4  ;;  %p505_p6 = scmp.lt.s32.totalorder %s496_s4, %s496_s4 }
  0x21   : > { %p499_p8 = pnand %p497_p7, %p485_p0  ;;  %p506_p5 = por %p505_p6, %p504_p9 }
  0x23   : > { %p500_p11 = pneg %p499_p8 }
  0x25   : > { %p507_p10 = pnand %p506_p5, %p500_p11 }
  0x27   : > { %510 = shalt.err (!%p507_p10)
}
  0x28   : > { %s580_s5 = smov 128   ;;  %s581_s6 = smov 8  }
  0x29   : > { %434 = dma.hbm_to_vmem [thread:$0]  (!%p660_p12), %s739_s1, 2048, %s107_s23, [#allocation3], %s580_s5, %s580_s5, %s581_s6  }
  0x2a   : > { %p748_p13 = scmp.ne.s32.totalorder %s746_s21, 0 }
  0x2b   : > { %p749_p1 = scmp.eq.s32.totalorder (!%p748_p13), %s624_s13, 0 }
  0x2c   : > { %129 = sbr.rel (%p748_p13) target bundleno = 414 (0x19e), region = 28 }
  0x33   : > { %556 = dma.done.wait (%p749_p1), [#allocation3], 2048   ;;  %p750_p0 = pmov %p749_p1 }
  0x34   : > { %p150_p5 = scmp.lt.s32.totalorder %s624_s13, 1  ;;  %v582_v0 = vmov 0   ;;  %v583_v1 = vmov 0.0|0.0   ;;  %v163_v3 = vld [vmem:[#allocation2] sm:$0xff]  ;;  %v164_v4 = vld [vmem:[#allocation2 + $0x8] sm:$0xff]  ;;  %v165_v6 = vld [vmem:[#allocation2 + $0x10] sm:$0xff]  ;;  %v155_v28 = vlaneseq }
  0x35   : > { %558 = vsyncadd (%p750_p0), [#allocation3], 4294965248  ;;  %482 = vset.pattern.permute.xlu0 %v582_v0  ;;  %401 = vmatprep.subr.bf16.mxu0 %v583_v1  ;;  %v402_v5 = vpack.c.bf16 %v164_v4, %v163_v3  ;;  %v166_v7 = vld [vmem:[#allocation2 + $0x18] sm:$0xff]  ;;  %vm584_vm0 = vmmov 0   ;;  %v585_v8 = vmov 0.0   ;;  %v167_v10 = vld [vmem:[#allocation2 + $0x20] sm:$0xff] }
  0x36   : > { %s151_s14 = scalar_select %p150_p5, %s624_s13, 1  ;;  %398 = vmatprep.mubr.msk.f32.mxu0 %vm584_vm0, %v585_v8  ;;  %v405_v9 = vpack.c.bf16 %v166_v7, %v165_v6  ;;  %v168_v11 = vld [vmem:[#allocation2 + $0x28] sm:$0xff]  ;;  %v169_v13 = vld [vmem:[#allocation2 + $0x30] sm:$0xff]  ;;  %v170_v14 = vld [vmem:[#allocation2 + $0x38] sm:$0xff]  ;;  %v156_v29 = vand.u32 127, %v155_v28  ;;  %v586_v31 = vmov 1.0  }
  0x37   : > { %403 = vmatpush3.bf16.msra.mxu0 %v402_v5  ;;  %v408_v12 = vpack.c.bf16 %v168_v11, %v167_v10  ;;  %v411_v15 = vpack.c.bf16 %v170_v14, %v169_v13  ;;  %v171_v16 = vld [vmem:[#allocation2 + $0x40] sm:$0xff]  ;;  %v172_v17 = vld [vmem:[#allocation2 + $0x48] sm:$0xff]  ;;  %v173_v19 = vld [vmem:[#allocation2 + $0x50] sm:$0xff]  ;;  %s147_s23 = sand.u32 1, %s569_s10   ;;  %s346_s27 = sshll.u32 %s624_s13, 7 }
  0x38   : > { %s342_s16 = sshll.u32 %s151_s14, 3  ;;  %404 = vmatprep.subr.bf16.mxu0 %v583_v1  ;;  %v414_v18 = vpack.c.bf16 %v172_v17, %v171_v16  ;;  %v174_v20 = vld [vmem:[#allocation2 + $0x58] sm:$0xff]  ;;  %v175_v22 = vld [vmem:[#allocation2 + $0x60] sm:$0xff]  ;;  %v176_v23 = vld [vmem:[#allocation2 + $0x68] sm:$0xff]  ;;  %s341_s24 = sshll.u32 %s147_s23, 3 }
  0x39   : > { %s153_s21 = scalar_lea.vmem %s738_s0, %s342_s16  ;;  %v417_v21 = vpack.c.bf16 %v174_v20, %v173_v19  ;;  %v420_v24 = vpack.c.bf16 %v176_v23, %v175_v22  ;;  %v177_v25 = vld [vmem:[#allocation2 + $0x70] sm:$0xff]  ;;  %v178_v26 = vld [vmem:[#allocation2 + $0x78] sm:$0xff]  ;;  %s149_s25 = scalar_lea.vmem [#allocation5], %s341_s24 }
  0x3a   : > { %v154_v2 = vld [vmem:[%s153_s21] sm:$0xff]  ;;  %v423_v27 = vpack.c.bf16 %v178_v26, %v177_v25  ;;  %s264_s26 = sshll.u32 %s149_s25, 4  ;;  %s698_s30 = scalar_lea.hbm %s740_s2, %s346_s27  ;;  %s693_s26 = int_to_ptr.vmem [resolvable:$true] %s264_s26 }
  0x3b   : > { %158 = vperm.xlu0 %482, %v154_v2   ;;  %406 = vmatpush3.bf16.msra.mxu0 %v405_v9  ;;  %s251_s3 = scalar_lea.sflag [#allocation4], %s147_s23  ;;  %s511_s4 = scalar_lea.vmem %s693_s26, 128 }
  0x3c   : > { %407 = vmatprep.subr.bf16.mxu0 %v583_v1  ;;  %p512_p6 = scmp.ne.s32.totalorder %s693_s26, %s511_s4  ;;  %p751_p9 = scmp.ne.s32.totalorder %s744_s19, 0 }
  0x3d   : > { %s587_s13 = smov [#allocation5]  }
  0x3e   : > { %p513_p10 = pnand %p512_p6, %p751_p9  ;;  %s515_s5 = sshll.u32 %s587_s13, 4  ;;  %s516_s5 = int_to_ptr.vmem [resolvable:$false] %s515_s5 }
  0x3f   : > { %409 = vmatpush3.bf16.msra.mxu0 %v408_v12  ;;  %s517_s6 = scalar_lea.vmem %s516_s5, 256  ;;  %p518_p2 = scmp.lt.s32.totalorder %s693_s26, %s516_s5 }
  0x40   : > { %410 = vmatprep.subr.bf16.mxu0 %v583_v1  ;;  %p514_p12 = pneg %p513_p10  ;;  %p519_p3 = scmp.lt.s32.totalorder %s517_s6, %s511_s4 }
  0x42   : > { %p520_p4 = por %p519_p3, %p518_p2 }
  0x43   : > { %412 = vmatpush3.bf16.msra.mxu0 %v411_v15 }
  0x44   : > { %413 = vmatprep.subr.bf16.mxu0 %v583_v1  ;;  %p521_p7 = pnand %p520_p4, %p514_p12 }
  0x47   : > { %415 = vmatpush3.bf16.msra.mxu0 %v414_v18 }
  0x48   : > { %416 = vmatprep.subr.bf16.mxu0 %v583_v1 }
  0x4b   : > { %418 = vmatpush3.bf16.msra.mxu0 %v417_v21 }
  0x4c   : > { %419 = vmatprep.subr.bf16.mxu0 %v583_v1 }
  0x4f   : > { %421 = vmatpush3.bf16.msra.mxu0 %v420_v24 }
  0x50   : > { %422 = vmatprep.subr.bf16.mxu0 %v583_v1 }
  0x53   : > { %424 = vmatpush3.bf16.msra.mxu0 %v423_v27 }
  0xba   : > { %v159_v30 = vpop.permute.xlu0 %158 }
  0xbb   : > { %vm160_vm1 = vcmp.eq.s32.totalorder %v156_v29, %v159_v30 }
  0xbc   : > { %399 = vmatmul.mubr.msk.f32.vlgmr.msra.gmra.mrb[0].mxu0 %vm160_vm1, %v586_v31 }
 0x18f   : > { %v245_v32 = vpop.f32.mrb[0].mxu0 }
 0x190   : > { %249 = vst [vmem:[%s149_s25] sm:$0xff] %v245_v32  ;;  %v400_v33 = vpop.f32.mrb[1].mxu0 }
 0x191   : > { %524 = shalt.err (!%p521_p7)
}
 0x192   : > { %s525_s7 = scalar_lea.hbm %s698_s30, 128  ;;  %s529_s16 = scalar_lea.hbm %s740_s2, 256 }
 0x193   : > { %p526_p8 = scmp.ne.s32.totalorder %s698_s30, %s525_s7  ;;  %p530_p1 = scmp.lt.u32.totalorder %s698_s30, %s740_s2 }
 0x194   : > { %p531_p0 = scmp.lt.u32.totalorder %s529_s16, %s525_s7  ;;  %p533_p6 = scmp.lt.u32.totalorder %s525_s7, %s698_s30 }
 0x195   : > { %p527_p11 = pnand %p526_p8, %p751_p9 }
 0x196   : > { %p532_p5 = por %p531_p0, %p530_p1 }
 0x197   : > { %p528_p13 = pneg %p527_p11 }
 0x198   : > { %p534_p10 = por %p533_p6, %p532_p5 }
 0x19a   : > { %p535_p12 = pnand %p534_p10, %p528_p13 }
 0x19c   : > { %538 = shalt.err (!%p535_p12)
}
 0x19d   : > { %429 = dma.vmem_to_hbm [thread:$0]  (%p751_p9), %s693_s26, 128, %s698_s30, %s251_s3  }
 0x19e PF: > { %p441_p2 = scmp.ge.s32.totalorder %s577_s12, 2  ;;  %s276_s21 = sand.u32 1, %s565_s9  }
 0x19f   : > { %p752_p3 = scmp.ne.s32.totalorder %s745_s20, 0  ;;  %s277_s23 = scalar_lea.sflag [#allocation4], %s276_s21 }
 0x1a1   : > { %p436_p4 = pnand %p441_p2, %p752_p3 }
 0x1a3   : > { %560 = dma.done.wait (!%p436_p4), %s277_s23, 128  }
 0x1a4   : > { %562 = vsyncadd (!%p436_p4), %s277_s23, 4294967168  ;;  %p13_p7 = scmp.ge.s32.totalorder %s628_s15, 4   ;;  %s753_s9 = smov %s569_s10 }
 0x1a5   : > { %s754_s10 = smov %s573_s11  ;;  %s755_s11 = smov %s639_s18 }
 0x1a6   : > { %s756_s12 = smov %s628_s15  ;;  %15 = sbr.rel (!%p13_p7) target bundleno = 4 (0x4), region = 68 }
 0x1ad   :  { %282 = vsyncpa [#allocation3], 1 }
 0x1ae   :  { %284 = vsyncpa [#allocation3 + $0x1], 1 }
 0x1af   :  { %285 = vsyncpa [#allocation4], 1 }
 0x1b0   :  { %287 = vsyncpa [#allocation4 + $0x1], 1 }

</bundles_post_ra>
